<compile_context>
chip_gen: v5e
topology: v5e:2x2
jax: 0.10.0
libtpu: 0.0.40
codegen_flags: <defaults>
</compile_context>

<pallas_src>
import jax
import jax.numpy as jnp
from jax.experimental import pallas as pl
from jax.experimental.pallas import tpu as pltpu

# --- Config (mirrors the PyTorch Config class) ---
TIME_STEPS = 5
HIDDEN_SIZE = 2
INPUT_SIZE = 2
OUTPUT_SIZE = 5
NUM_LAYERS = 2

LANES = 128

# Row layout of the packed parameter slab (rows x 128 lanes, f32):
#   rows R_W0 .. R_W0+I+H-1 : [W_ih_l0.T ; W_hh_l0.T]   each row is (1, H) (zero-padded)
#   row  R_B0               : b_ih_l0 + b_hh_l0          (1, H)
#   rows R_W1 .. R_W1+2H-1  : [W_ih_l1.T ; W_hh_l1.T]    each row (1, H)
#   row  R_B1               : b_ih_l1 + b_hh_l1          (1, H)
#   rows R_WFC .. +H-1      : W_fc.T rows                each row (1, O)
#   row  R_BFC              : b_fc                       (1, O)
R_W0 = 0
R_B0 = R_W0 + INPUT_SIZE + HIDDEN_SIZE            # 4
R_W1 = R_B0 + 1                                   # 5
R_B1 = R_W1 + 2 * HIDDEN_SIZE                     # 9
R_WFC = R_B1 + 1                                  # 10
R_BFC = R_WFC + HIDDEN_SIZE                       # 12
SLAB_ROWS = 16                                    # pad 13 -> 16 (multiple of 8)


def weather_rnn_kernel(x_ref, p_ref, out_ref):
    """x_ref: (B, T*I) f32, p_ref: (SLAB_ROWS, 128) f32, out_ref: (B, 128) f32."""
    B = x_ref.shape[0]
    H, I = HIDDEN_SIZE, INPUT_SIZE

    x = x_ref[...]          # (B, T*I)  — whole input is a fraction of one vreg
    P = p_ref[...]          # (SLAB_ROWS, 128)

    # Loop-invariant weight rows / biases, hoisted out of the (unrolled) time loop.
    w0 = [P[R_W0 + k:R_W0 + k + 1, 0:H] for k in range(I + H)]    # each (1, H)
    b0 = P[R_B0:R_B0 + 1, 0:H]                                    # (1, H)
    w1 = [P[R_W1 + k:R_W1 + k + 1, 0:H] for k in range(2 * H)]    # each (1, H)
    b1 = P[R_B1:R_B1 + 1, 0:H]                                    # (1, H)
    wfc = [P[R_WFC + j:R_WFC + j + 1, :] for j in range(H)]       # each (1, 128)
    bfc = P[R_BFC:R_BFC + 1, :]                                   # (1, 128)

    # Hidden state lives in vregs; never touches VMEM inside the recurrence.
    h1 = jnp.zeros((B, H), jnp.float32)
    h2 = jnp.zeros((B, H), jnp.float32)

    # T is static -> fully unrolled; each 2x2 "matmul" is pure VPU broadcast FMAs.
    for t in range(TIME_STEPS):
        # layer 0: tanh(x_t @ W_ih0.T + h1 @ W_hh0.T + (b_ih0 + b_hh0))
        z = b0
        for k in range(I):
            c = t * I + k
            z = z + x[:, c:c + 1] * w0[k]
        for j in range(H):
            z = z + h1[:, j:j + 1] * w0[I + j]
        h1 = jnp.tanh(z)

        # layer 1: tanh(h1 @ W_ih1.T + h2 @ W_hh1.T + (b_ih1 + b_hh1))
        z = b1
        for k in range(H):
            z = z + h1[:, k:k + 1] * w1[k]
        for j in range(H):
            z = z + h2[:, j:j + 1] * w1[H + j]
        h2 = jnp.tanh(z)

    # FC on the last hidden state. Lane-dense (B, 128) store; padded weight/bias
    # lanes are zero so columns >= OUTPUT_SIZE are exactly 0 (sliced off by wrapper).
    out = bfc + h2[:, 0:1] * wfc[0]
    for j in range(1, H):
        out = out + h2[:, j:j + 1] * wfc[j]
    out_ref[...] = out


def pack_params(params):
    """Pack all weights/biases into one (SLAB_ROWS, 128) f32 slab (single DMA)."""
    def pad_lanes(a):
        return jnp.pad(a.astype(jnp.float32), ((0, 0), (0, LANES - a.shape[1])))

    w0t = jnp.concatenate([params["w_ih_l0"].T, params["w_hh_l0"].T], axis=0)  # (I+H, H)
    b0 = params["b_ih_l0"] + params["b_hh_l0"]                                 # (1, H)
    w1t = jnp.concatenate([params["w_ih_l1"].T, params["w_hh_l1"].T], axis=0)  # (2H, H)
    b1 = params["b_ih_l1"] + params["b_hh_l1"]                                 # (1, H)
    wfct = params["w_fc"].T                                                    # (H, O)
    bfc = params["b_fc"]                                                       # (1, O)

    slab = jnp.concatenate(
        [pad_lanes(b) for b in (w0t, b0, w1t, b1, wfct, bfc)], axis=0
    )                                                                          # (13, 128)
    slab = jnp.pad(slab, ((0, SLAB_ROWS - slab.shape[0]), (0, 0)))             # (16, 128)
    return slab


def weather_rnn_forward(x_btc, params):
    """x_btc: (B, T, INPUT_SIZE) float32, batch_first like the PyTorch module."""
    B, T, I = x_btc.shape
    x2 = x_btc.reshape(B, T * I)      # contiguous reshape, no transpose / HBM round trip
    slab = pack_params(params)

    vmem = pltpu.MemorySpace.VMEM
    out_padded = pl.pallas_call(
        weather_rnn_kernel,
        out_shape=jax.ShapeDtypeStruct((B, LANES), jnp.float32),
        in_specs=[pl.BlockSpec(memory_space=vmem),
                  pl.BlockSpec(memory_space=vmem)],
        out_specs=pl.BlockSpec(memory_space=vmem),
    )(x2, slab)
    return out_padded[:, :OUTPUT_SIZE]


def init_params(key):
    """Deterministic init mimicking PyTorch's U(-1/sqrt(H), 1/sqrt(H))."""
    ks = jax.random.split(key, 11)
    bound = 1.0 / jnp.sqrt(jnp.float32(HIDDEN_SIZE))

    def u(k, shape):
        return jax.random.uniform(k, shape, jnp.float32, -bound, bound)

    return {
        "w_ih_l0": u(ks[0], (HIDDEN_SIZE, INPUT_SIZE)),
        "w_hh_l0": u(ks[1], (HIDDEN_SIZE, HIDDEN_SIZE)),
        "b_ih_l0": u(ks[2], (1, HIDDEN_SIZE)),
        "b_hh_l0": u(ks[3], (1, HIDDEN_SIZE)),
        "w_ih_l1": u(ks[4], (HIDDEN_SIZE, HIDDEN_SIZE)),
        "w_hh_l1": u(ks[5], (HIDDEN_SIZE, HIDDEN_SIZE)),
        "b_ih_l1": u(ks[6], (1, HIDDEN_SIZE)),
        "b_hh_l1": u(ks[7], (1, HIDDEN_SIZE)),
        "w_fc": u(ks[8], (OUTPUT_SIZE, HIDDEN_SIZE)),
        "b_fc": u(ks[9], (1, OUTPUT_SIZE)),
    }


def reference_forward(x_btc, params):
    """Pure-JAX reference matching PyTorch nn.RNN(num_layers=2) + Linear.

    Contractions done as exact f32 broadcast sums (no MXU precision ambiguity).
    """
    B, T, _ = x_btc.shape

    def dense(inp, W, b):  # inp: (B, K), W: (H, K), b: (1, H) -> inp @ W.T + b
        return jnp.sum(inp[:, None, :] * W[None, :, :], axis=-1) + b

    h1 = jnp.zeros((B, HIDDEN_SIZE), jnp.float32)
    h2 = jnp.zeros((B, HIDDEN_SIZE), jnp.float32)
    for t in range(T):
        x_t = x_btc[:, t, :]
        h1 = jnp.tanh(dense(x_t, params["w_ih_l0"], params["b_ih_l0"])
                      + dense(h1, params["w_hh_l0"], params["b_hh_l0"])
                      - params["b_hh_l0"] + params["b_hh_l0"])  # keep simple grouping
        h2 = jnp.tanh(dense(h1, params["w_ih_l1"], params["b_ih_l1"])
                      + dense(h2, params["w_hh_l1"], params["b_hh_l1"])
                      - params["b_hh_l1"] + params["b_hh_l1"])
    return dense(h2, params["w_fc"], params["b_fc"])


if __name__ == "__main__":
    key = jax.random.PRNGKey(0)
    k_x, k_p = jax.random.split(key)

    B = 8
    x = jax.random.normal(k_x, (B, TIME_STEPS, INPUT_SIZE), jnp.float32)
    params = init_params(k_p)

    out = weather_rnn_forward(x, params)
    out = jax.block_until_ready(out)

    ref = reference_forward(x, params)
    assert out.shape == (B, OUTPUT_SIZE)
    assert jnp.allclose(out, ref, atol=1e-4, rtol=1e-4), (
        f"max abs diff = {jnp.max(jnp.abs(out - ref))}"
    )

    print("KERNEL_OK")
</pallas_src>

<mosaic_0001>
module attributes {stable_mosaic.version = 11 : i64} {
  func.func @weather_rnn_kernel(%arg0: memref<8x10xf32, #tpu.memory_space<vmem>>, %arg1: memref<16x128xf32, #tpu.memory_space<vmem>>, %arg2: memref<8x128xf32, #tpu.memory_space<vmem>>) attributes {dimension_semantics = [], scalar_prefetch = 0 : i64, scratch_operands = 0 : i64, tpu.core_type = #tpu.core_type<tc>} {
    %c0 = arith.constant 0 : index
    %c0_0 = arith.constant 0 : index
    %0 = vector.load %arg0[%c0, %c0_0] : memref<8x10xf32, #tpu.memory_space<vmem>>, vector<8x10xf32>
    %c0_1 = arith.constant 0 : index
    %c0_2 = arith.constant 0 : index
    %1 = vector.load %arg1[%c0_1, %c0_2] : memref<16x128xf32, #tpu.memory_space<vmem>>, vector<16x128xf32>
    %2 = vector.extract_strided_slice %1 {offsets = [0, 0], sizes = [1, 2], strides = [1, 1]} : vector<16x128xf32> to vector<1x2xf32>
    %3 = vector.extract_strided_slice %1 {offsets = [1, 0], sizes = [1, 2], strides = [1, 1]} : vector<16x128xf32> to vector<1x2xf32>
    %4 = vector.extract_strided_slice %1 {offsets = [2, 0], sizes = [1, 2], strides = [1, 1]} : vector<16x128xf32> to vector<1x2xf32>
    %5 = vector.extract_strided_slice %1 {offsets = [3, 0], sizes = [1, 2], strides = [1, 1]} : vector<16x128xf32> to vector<1x2xf32>
    %6 = vector.extract_strided_slice %1 {offsets = [4, 0], sizes = [1, 2], strides = [1, 1]} : vector<16x128xf32> to vector<1x2xf32>
    %7 = vector.extract_strided_slice %1 {offsets = [5, 0], sizes = [1, 2], strides = [1, 1]} : vector<16x128xf32> to vector<1x2xf32>
    %8 = vector.extract_strided_slice %1 {offsets = [6, 0], sizes = [1, 2], strides = [1, 1]} : vector<16x128xf32> to vector<1x2xf32>
    %9 = vector.extract_strided_slice %1 {offsets = [7, 0], sizes = [1, 2], strides = [1, 1]} : vector<16x128xf32> to vector<1x2xf32>
    %10 = vector.extract_strided_slice %1 {offsets = [8, 0], sizes = [1, 2], strides = [1, 1]} : vector<16x128xf32> to vector<1x2xf32>
    %11 = vector.extract_strided_slice %1 {offsets = [9, 0], sizes = [1, 2], strides = [1, 1]} : vector<16x128xf32> to vector<1x2xf32>
    %12 = vector.extract_strided_slice %1 {offsets = [10, 0], sizes = [1, 128], strides = [1, 1]} : vector<16x128xf32> to vector<1x128xf32>
    %13 = vector.extract_strided_slice %1 {offsets = [11, 0], sizes = [1, 128], strides = [1, 1]} : vector<16x128xf32> to vector<1x128xf32>
    %14 = vector.extract_strided_slice %1 {offsets = [12, 0], sizes = [1, 128], strides = [1, 1]} : vector<16x128xf32> to vector<1x128xf32>
    %cst = arith.constant 0.000000e+00 : f32
    %15 = vector.broadcast %cst : f32 to vector<8x2xf32>
    %cst_3 = arith.constant 0.000000e+00 : f32
    %16 = vector.broadcast %cst_3 : f32 to vector<8x2xf32>
    %17 = vector.extract_strided_slice %0 {offsets = [0, 0], sizes = [8, 1], strides = [1, 1]} : vector<8x10xf32> to vector<8x1xf32>
    %18 = vector.broadcast %17 : vector<8x1xf32> to vector<8x2xf32>
    %19 = vector.broadcast %2 : vector<1x2xf32> to vector<8x2xf32>
    %20 = arith.mulf %18, %19 : vector<8x2xf32>
    %21 = vector.broadcast %6 : vector<1x2xf32> to vector<8x2xf32>
    %22 = arith.addf %21, %20 : vector<8x2xf32>
    %23 = vector.extract_strided_slice %0 {offsets = [0, 1], sizes = [8, 1], strides = [1, 1]} : vector<8x10xf32> to vector<8x1xf32>
    %24 = vector.broadcast %23 : vector<8x1xf32> to vector<8x2xf32>
    %25 = vector.broadcast %3 : vector<1x2xf32> to vector<8x2xf32>
    %26 = arith.mulf %24, %25 : vector<8x2xf32>
    %27 = arith.addf %22, %26 : vector<8x2xf32>
    %28 = vector.extract_strided_slice %15 {offsets = [0, 0], sizes = [8, 1], strides = [1, 1]} : vector<8x2xf32> to vector<8x1xf32>
    %29 = vector.broadcast %28 : vector<8x1xf32> to vector<8x2xf32>
    %30 = vector.broadcast %4 : vector<1x2xf32> to vector<8x2xf32>
    %31 = arith.mulf %29, %30 : vector<8x2xf32>
    %32 = arith.addf %27, %31 : vector<8x2xf32>
    %33 = vector.extract_strided_slice %15 {offsets = [0, 1], sizes = [8, 1], strides = [1, 1]} : vector<8x2xf32> to vector<8x1xf32>
    %34 = vector.broadcast %33 : vector<8x1xf32> to vector<8x2xf32>
    %35 = vector.broadcast %5 : vector<1x2xf32> to vector<8x2xf32>
    %36 = arith.mulf %34, %35 : vector<8x2xf32>
    %37 = arith.addf %32, %36 : vector<8x2xf32>
    %38 = math.tanh %37 : vector<8x2xf32>
    %39 = vector.extract_strided_slice %38 {offsets = [0, 0], sizes = [8, 1], strides = [1, 1]} : vector<8x2xf32> to vector<8x1xf32>
    %40 = vector.broadcast %39 : vector<8x1xf32> to vector<8x2xf32>
    %41 = vector.broadcast %7 : vector<1x2xf32> to vector<8x2xf32>
    %42 = arith.mulf %40, %41 : vector<8x2xf32>
    %43 = vector.broadcast %11 : vector<1x2xf32> to vector<8x2xf32>
    %44 = arith.addf %43, %42 : vector<8x2xf32>
    %45 = vector.extract_strided_slice %38 {offsets = [0, 1], sizes = [8, 1], strides = [1, 1]} : vector<8x2xf32> to vector<8x1xf32>
    %46 = vector.broadcast %45 : vector<8x1xf32> to vector<8x2xf32>
    %47 = vector.broadcast %8 : vector<1x2xf32> to vector<8x2xf32>
    %48 = arith.mulf %46, %47 : vector<8x2xf32>
    %49 = arith.addf %44, %48 : vector<8x2xf32>
    %50 = vector.extract_strided_slice %16 {offsets = [0, 0], sizes = [8, 1], strides = [1, 1]} : vector<8x2xf32> to vector<8x1xf32>
    %51 = vector.broadcast %50 : vector<8x1xf32> to vector<8x2xf32>
    %52 = vector.broadcast %9 : vector<1x2xf32> to vector<8x2xf32>
    %53 = arith.mulf %51, %52 : vector<8x2xf32>
    %54 = arith.addf %49, %53 : vector<8x2xf32>
    %55 = vector.extract_strided_slice %16 {offsets = [0, 1], sizes = [8, 1], strides = [1, 1]} : vector<8x2xf32> to vector<8x1xf32>
    %56 = vector.broadcast %55 : vector<8x1xf32> to vector<8x2xf32>
    %57 = vector.broadcast %10 : vector<1x2xf32> to vector<8x2xf32>
    %58 = arith.mulf %56, %57 : vector<8x2xf32>
    %59 = arith.addf %54, %58 : vector<8x2xf32>
    %60 = math.tanh %59 : vector<8x2xf32>
    %61 = vector.extract_strided_slice %0 {offsets = [0, 2], sizes = [8, 1], strides = [1, 1]} : vector<8x10xf32> to vector<8x1xf32>
    %62 = vector.broadcast %61 : vector<8x1xf32> to vector<8x2xf32>
    %63 = vector.broadcast %2 : vector<1x2xf32> to vector<8x2xf32>
    %64 = arith.mulf %62, %63 : vector<8x2xf32>
    %65 = vector.broadcast %6 : vector<1x2xf32> to vector<8x2xf32>
    %66 = arith.addf %65, %64 : vector<8x2xf32>
    %67 = vector.extract_strided_slice %0 {offsets = [0, 3], sizes = [8, 1], strides = [1, 1]} : vector<8x10xf32> to vector<8x1xf32>
    %68 = vector.broadcast %67 : vector<8x1xf32> to vector<8x2xf32>
    %69 = vector.broadcast %3 : vector<1x2xf32> to vector<8x2xf32>
    %70 = arith.mulf %68, %69 : vector<8x2xf32>
    %71 = arith.addf %66, %70 : vector<8x2xf32>
    %72 = vector.extract_strided_slice %38 {offsets = [0, 0], sizes = [8, 1], strides = [1, 1]} : vector<8x2xf32> to vector<8x1xf32>
    %73 = vector.broadcast %72 : vector<8x1xf32> to vector<8x2xf32>
    %74 = vector.broadcast %4 : vector<1x2xf32> to vector<8x2xf32>
    %75 = arith.mulf %73, %74 : vector<8x2xf32>
    %76 = arith.addf %71, %75 : vector<8x2xf32>
    %77 = vector.extract_strided_slice %38 {offsets = [0, 1], sizes = [8, 1], strides = [1, 1]} : vector<8x2xf32> to vector<8x1xf32>
    %78 = vector.broadcast %77 : vector<8x1xf32> to vector<8x2xf32>
    %79 = vector.broadcast %5 : vector<1x2xf32> to vector<8x2xf32>
    %80 = arith.mulf %78, %79 : vector<8x2xf32>
    %81 = arith.addf %76, %80 : vector<8x2xf32>
    %82 = math.tanh %81 : vector<8x2xf32>
    %83 = vector.extract_strided_slice %82 {offsets = [0, 0], sizes = [8, 1], strides = [1, 1]} : vector<8x2xf32> to vector<8x1xf32>
    %84 = vector.broadcast %83 : vector<8x1xf32> to vector<8x2xf32>
    %85 = vector.broadcast %7 : vector<1x2xf32> to vector<8x2xf32>
    %86 = arith.mulf %84, %85 : vector<8x2xf32>
    %87 = vector.broadcast %11 : vector<1x2xf32> to vector<8x2xf32>
    %88 = arith.addf %87, %86 : vector<8x2xf32>
    %89 = vector.extract_strided_slice %82 {offsets = [0, 1], sizes = [8, 1], strides = [1, 1]} : vector<8x2xf32> to vector<8x1xf32>
    %90 = vector.broadcast %89 : vector<8x1xf32> to vector<8x2xf32>
    %91 = vector.broadcast %8 : vector<1x2xf32> to vector<8x2xf32>
    %92 = arith.mulf %90, %91 : vector<8x2xf32>
    %93 = arith.addf %88, %92 : vector<8x2xf32>
    %94 = vector.extract_strided_slice %60 {offsets = [0, 0], sizes = [8, 1], strides = [1, 1]} : vector<8x2xf32> to vector<8x1xf32>
    %95 = vector.broadcast %94 : vector<8x1xf32> to vector<8x2xf32>
    %96 = vector.broadcast %9 : vector<1x2xf32> to vector<8x2xf32>
    %97 = arith.mulf %95, %96 : vector<8x2xf32>
    %98 = arith.addf %93, %97 : vector<8x2xf32>
    %99 = vector.extract_strided_slice %60 {offsets = [0, 1], sizes = [8, 1], strides = [1, 1]} : vector<8x2xf32> to vector<8x1xf32>
    %100 = vector.broadcast %99 : vector<8x1xf32> to vector<8x2xf32>
    %101 = vector.broadcast %10 : vector<1x2xf32> to vector<8x2xf32>
    %102 = arith.mulf %100, %101 : vector<8x2xf32>
    %103 = arith.addf %98, %102 : vector<8x2xf32>
    %104 = math.tanh %103 : vector<8x2xf32>
    %105 = vector.extract_strided_slice %0 {offsets = [0, 4], sizes = [8, 1], strides = [1, 1]} : vector<8x10xf32> to vector<8x1xf32>
    %106 = vector.broadcast %105 : vector<8x1xf32> to vector<8x2xf32>
    %107 = vector.broadcast %2 : vector<1x2xf32> to vector<8x2xf32>
    %108 = arith.mulf %106, %107 : vector<8x2xf32>
    %109 = vector.broadcast %6 : vector<1x2xf32> to vector<8x2xf32>
    %110 = arith.addf %109, %108 : vector<8x2xf32>
    %111 = vector.extract_strided_slice %0 {offsets = [0, 5], sizes = [8, 1], strides = [1, 1]} : vector<8x10xf32> to vector<8x1xf32>
    %112 = vector.broadcast %111 : vector<8x1xf32> to vector<8x2xf32>
    %113 = vector.broadcast %3 : vector<1x2xf32> to vector<8x2xf32>
    %114 = arith.mulf %112, %113 : vector<8x2xf32>
    %115 = arith.addf %110, %114 : vector<8x2xf32>
    %116 = vector.extract_strided_slice %82 {offsets = [0, 0], sizes = [8, 1], strides = [1, 1]} : vector<8x2xf32> to vector<8x1xf32>
    %117 = vector.broadcast %116 : vector<8x1xf32> to vector<8x2xf32>
    %118 = vector.broadcast %4 : vector<1x2xf32> to vector<8x2xf32>
    %119 = arith.mulf %117, %118 : vector<8x2xf32>
    %120 = arith.addf %115, %119 : vector<8x2xf32>
    %121 = vector.extract_strided_slice %82 {offsets = [0, 1], sizes = [8, 1], strides = [1, 1]} : vector<8x2xf32> to vector<8x1xf32>
    %122 = vector.broadcast %121 : vector<8x1xf32> to vector<8x2xf32>
    %123 = vector.broadcast %5 : vector<1x2xf32> to vector<8x2xf32>
    %124 = arith.mulf %122, %123 : vector<8x2xf32>
    %125 = arith.addf %120, %124 : vector<8x2xf32>
    %126 = math.tanh %125 : vector<8x2xf32>
    %127 = vector.extract_strided_slice %126 {offsets = [0, 0], sizes = [8, 1], strides = [1, 1]} : vector<8x2xf32> to vector<8x1xf32>
    %128 = vector.broadcast %127 : vector<8x1xf32> to vector<8x2xf32>
    %129 = vector.broadcast %7 : vector<1x2xf32> to vector<8x2xf32>
    %130 = arith.mulf %128, %129 : vector<8x2xf32>
    %131 = vector.broadcast %11 : vector<1x2xf32> to vector<8x2xf32>
    %132 = arith.addf %131, %130 : vector<8x2xf32>
    %133 = vector.extract_strided_slice %126 {offsets = [0, 1], sizes = [8, 1], strides = [1, 1]} : vector<8x2xf32> to vector<8x1xf32>
    %134 = vector.broadcast %133 : vector<8x1xf32> to vector<8x2xf32>
    %135 = vector.broadcast %8 : vector<1x2xf32> to vector<8x2xf32>
    %136 = arith.mulf %134, %135 : vector<8x2xf32>
    %137 = arith.addf %132, %136 : vector<8x2xf32>
    %138 = vector.extract_strided_slice %104 {offsets = [0, 0], sizes = [8, 1], strides = [1, 1]} : vector<8x2xf32> to vector<8x1xf32>
    %139 = vector.broadcast %138 : vector<8x1xf32> to vector<8x2xf32>
    %140 = vector.broadcast %9 : vector<1x2xf32> to vector<8x2xf32>
    %141 = arith.mulf %139, %140 : vector<8x2xf32>
    %142 = arith.addf %137, %141 : vector<8x2xf32>
    %143 = vector.extract_strided_slice %104 {offsets = [0, 1], sizes = [8, 1], strides = [1, 1]} : vector<8x2xf32> to vector<8x1xf32>
    %144 = vector.broadcast %143 : vector<8x1xf32> to vector<8x2xf32>
    %145 = vector.broadcast %10 : vector<1x2xf32> to vector<8x2xf32>
    %146 = arith.mulf %144, %145 : vector<8x2xf32>
    %147 = arith.addf %142, %146 : vector<8x2xf32>
    %148 = math.tanh %147 : vector<8x2xf32>
    %149 = vector.extract_strided_slice %0 {offsets = [0, 6], sizes = [8, 1], strides = [1, 1]} : vector<8x10xf32> to vector<8x1xf32>
    %150 = vector.broadcast %149 : vector<8x1xf32> to vector<8x2xf32>
    %151 = vector.broadcast %2 : vector<1x2xf32> to vector<8x2xf32>
    %152 = arith.mulf %150, %151 : vector<8x2xf32>
    %153 = vector.broadcast %6 : vector<1x2xf32> to vector<8x2xf32>
    %154 = arith.addf %153, %152 : vector<8x2xf32>
    %155 = vector.extract_strided_slice %0 {offsets = [0, 7], sizes = [8, 1], strides = [1, 1]} : vector<8x10xf32> to vector<8x1xf32>
    %156 = vector.broadcast %155 : vector<8x1xf32> to vector<8x2xf32>
    %157 = vector.broadcast %3 : vector<1x2xf32> to vector<8x2xf32>
    %158 = arith.mulf %156, %157 : vector<8x2xf32>
    %159 = arith.addf %154, %158 : vector<8x2xf32>
    %160 = vector.extract_strided_slice %126 {offsets = [0, 0], sizes = [8, 1], strides = [1, 1]} : vector<8x2xf32> to vector<8x1xf32>
    %161 = vector.broadcast %160 : vector<8x1xf32> to vector<8x2xf32>
    %162 = vector.broadcast %4 : vector<1x2xf32> to vector<8x2xf32>
    %163 = arith.mulf %161, %162 : vector<8x2xf32>
    %164 = arith.addf %159, %163 : vector<8x2xf32>
    %165 = vector.extract_strided_slice %126 {offsets = [0, 1], sizes = [8, 1], strides = [1, 1]} : vector<8x2xf32> to vector<8x1xf32>
    %166 = vector.broadcast %165 : vector<8x1xf32> to vector<8x2xf32>
    %167 = vector.broadcast %5 : vector<1x2xf32> to vector<8x2xf32>
    %168 = arith.mulf %166, %167 : vector<8x2xf32>
    %169 = arith.addf %164, %168 : vector<8x2xf32>
    %170 = math.tanh %169 : vector<8x2xf32>
    %171 = vector.extract_strided_slice %170 {offsets = [0, 0], sizes = [8, 1], strides = [1, 1]} : vector<8x2xf32> to vector<8x1xf32>
    %172 = vector.broadcast %171 : vector<8x1xf32> to vector<8x2xf32>
    %173 = vector.broadcast %7 : vector<1x2xf32> to vector<8x2xf32>
    %174 = arith.mulf %172, %173 : vector<8x2xf32>
    %175 = vector.broadcast %11 : vector<1x2xf32> to vector<8x2xf32>
    %176 = arith.addf %175, %174 : vector<8x2xf32>
    %177 = vector.extract_strided_slice %170 {offsets = [0, 1], sizes = [8, 1], strides = [1, 1]} : vector<8x2xf32> to vector<8x1xf32>
    %178 = vector.broadcast %177 : vector<8x1xf32> to vector<8x2xf32>
    %179 = vector.broadcast %8 : vector<1x2xf32> to vector<8x2xf32>
    %180 = arith.mulf %178, %179 : vector<8x2xf32>
    %181 = arith.addf %176, %180 : vector<8x2xf32>
    %182 = vector.extract_strided_slice %148 {offsets = [0, 0], sizes = [8, 1], strides = [1, 1]} : vector<8x2xf32> to vector<8x1xf32>
    %183 = vector.broadcast %182 : vector<8x1xf32> to vector<8x2xf32>
    %184 = vector.broadcast %9 : vector<1x2xf32> to vector<8x2xf32>
    %185 = arith.mulf %183, %184 : vector<8x2xf32>
    %186 = arith.addf %181, %185 : vector<8x2xf32>
    %187 = vector.extract_strided_slice %148 {offsets = [0, 1], sizes = [8, 1], strides = [1, 1]} : vector<8x2xf32> to vector<8x1xf32>
    %188 = vector.broadcast %187 : vector<8x1xf32> to vector<8x2xf32>
    %189 = vector.broadcast %10 : vector<1x2xf32> to vector<8x2xf32>
    %190 = arith.mulf %188, %189 : vector<8x2xf32>
    %191 = arith.addf %186, %190 : vector<8x2xf32>
    %192 = math.tanh %191 : vector<8x2xf32>
    %193 = vector.extract_strided_slice %0 {offsets = [0, 8], sizes = [8, 1], strides = [1, 1]} : vector<8x10xf32> to vector<8x1xf32>
    %194 = vector.broadcast %193 : vector<8x1xf32> to vector<8x2xf32>
    %195 = vector.broadcast %2 : vector<1x2xf32> to vector<8x2xf32>
    %196 = arith.mulf %194, %195 : vector<8x2xf32>
    %197 = vector.broadcast %6 : vector<1x2xf32> to vector<8x2xf32>
    %198 = arith.addf %197, %196 : vector<8x2xf32>
    %199 = vector.extract_strided_slice %0 {offsets = [0, 9], sizes = [8, 1], strides = [1, 1]} : vector<8x10xf32> to vector<8x1xf32>
    %200 = vector.broadcast %199 : vector<8x1xf32> to vector<8x2xf32>
    %201 = vector.broadcast %3 : vector<1x2xf32> to vector<8x2xf32>
    %202 = arith.mulf %200, %201 : vector<8x2xf32>
    %203 = arith.addf %198, %202 : vector<8x2xf32>
    %204 = vector.extract_strided_slice %170 {offsets = [0, 0], sizes = [8, 1], strides = [1, 1]} : vector<8x2xf32> to vector<8x1xf32>
    %205 = vector.broadcast %204 : vector<8x1xf32> to vector<8x2xf32>
    %206 = vector.broadcast %4 : vector<1x2xf32> to vector<8x2xf32>
    %207 = arith.mulf %205, %206 : vector<8x2xf32>
    %208 = arith.addf %203, %207 : vector<8x2xf32>
    %209 = vector.extract_strided_slice %170 {offsets = [0, 1], sizes = [8, 1], strides = [1, 1]} : vector<8x2xf32> to vector<8x1xf32>
    %210 = vector.broadcast %209 : vector<8x1xf32> to vector<8x2xf32>
    %211 = vector.broadcast %5 : vector<1x2xf32> to vector<8x2xf32>
    %212 = arith.mulf %210, %211 : vector<8x2xf32>
    %213 = arith.addf %208, %212 : vector<8x2xf32>
    %214 = math.tanh %213 : vector<8x2xf32>
    %215 = vector.extract_strided_slice %214 {offsets = [0, 0], sizes = [8, 1], strides = [1, 1]} : vector<8x2xf32> to vector<8x1xf32>
    %216 = vector.broadcast %215 : vector<8x1xf32> to vector<8x2xf32>
    %217 = vector.broadcast %7 : vector<1x2xf32> to vector<8x2xf32>
    %218 = arith.mulf %216, %217 : vector<8x2xf32>
    %219 = vector.broadcast %11 : vector<1x2xf32> to vector<8x2xf32>
    %220 = arith.addf %219, %218 : vector<8x2xf32>
    %221 = vector.extract_strided_slice %214 {offsets = [0, 1], sizes = [8, 1], strides = [1, 1]} : vector<8x2xf32> to vector<8x1xf32>
    %222 = vector.broadcast %221 : vector<8x1xf32> to vector<8x2xf32>
    %223 = vector.broadcast %8 : vector<1x2xf32> to vector<8x2xf32>
    %224 = arith.mulf %222, %223 : vector<8x2xf32>
    %225 = arith.addf %220, %224 : vector<8x2xf32>
    %226 = vector.extract_strided_slice %192 {offsets = [0, 0], sizes = [8, 1], strides = [1, 1]} : vector<8x2xf32> to vector<8x1xf32>
    %227 = vector.broadcast %226 : vector<8x1xf32> to vector<8x2xf32>
    %228 = vector.broadcast %9 : vector<1x2xf32> to vector<8x2xf32>
    %229 = arith.mulf %227, %228 : vector<8x2xf32>
    %230 = arith.addf %225, %229 : vector<8x2xf32>
    %231 = vector.extract_strided_slice %192 {offsets = [0, 1], sizes = [8, 1], strides = [1, 1]} : vector<8x2xf32> to vector<8x1xf32>
    %232 = vector.broadcast %231 : vector<8x1xf32> to vector<8x2xf32>
    %233 = vector.broadcast %10 : vector<1x2xf32> to vector<8x2xf32>
    %234 = arith.mulf %232, %233 : vector<8x2xf32>
    %235 = arith.addf %230, %234 : vector<8x2xf32>
    %236 = math.tanh %235 : vector<8x2xf32>
    %237 = vector.extract_strided_slice %236 {offsets = [0, 0], sizes = [8, 1], strides = [1, 1]} : vector<8x2xf32> to vector<8x1xf32>
    %238 = vector.broadcast %237 : vector<8x1xf32> to vector<8x128xf32>
    %239 = vector.broadcast %12 : vector<1x128xf32> to vector<8x128xf32>
    %240 = arith.mulf %238, %239 : vector<8x128xf32>
    %241 = vector.broadcast %14 : vector<1x128xf32> to vector<8x128xf32>
    %242 = arith.addf %241, %240 : vector<8x128xf32>
    %243 = vector.extract_strided_slice %236 {offsets = [0, 1], sizes = [8, 1], strides = [1, 1]} : vector<8x2xf32> to vector<8x1xf32>
    %244 = vector.broadcast %243 : vector<8x1xf32> to vector<8x128xf32>
    %245 = vector.broadcast %13 : vector<1x128xf32> to vector<8x128xf32>
    %246 = arith.mulf %244, %245 : vector<8x128xf32>
    %247 = arith.addf %242, %246 : vector<8x128xf32>
    %c0_4 = arith.constant 0 : index
    %c0_5 = arith.constant 0 : index
    %248 = vector.load %arg2[%c0_4, %c0_5] : memref<8x128xf32, #tpu.memory_space<vmem>>, vector<8x128xf32>
    tpu.vector_store %arg2[%c0_4, %c0_5], %247 {strides = array<i32>} : memref<8x128xf32, #tpu.memory_space<vmem>>, vector<8x128xf32>,
    return
  }
}

</mosaic_0001>

<bundles_post_ra>
// kernel: tpu_custom_call.1
= control target key start
LH: loop header
LB: loop body
LE: loop exit
PB: predicated region body
PF: predicated region fallthrough
CT: control target
= control target key end

     0   :  { %7 = vsyncpa [#allocation3], 0  ;;  %s585_s0 = inlined_call_operand.hbm [shape: f32[8,10], index: 0, kind: input, shape index: {}]   ;;  %s586_s1 = inlined_call_operand.hbm [shape: f32[16,128], index: 1, kind: input, shape index: {}]   ;;  %s587_s2 = inlined_call_operand.hbm [shape: f32[8,128], index: 2, kind: output, shape index: {}]  }
   0x1   :  { %8 = vsyncpa [#allocation6], 0 }
   0x2   :  { %9 = vsyncpa [#allocation4], 0  ;;  %s15_s11 = sshll.u32 %s585_s0, 4  ;;  %s440_s12 = smov [#allocation2]   ;;  %s16_s11 = int_to_ptr.hbm [resolvable:$true] %s15_s11 }
   0x3   :  { %s17_s13 = sshll.u32 %s440_s12, 4  ;;  %s25_s16 = sshll.u32 %s586_s1, 4  ;;  %s18_s13 = int_to_ptr.vmem [resolvable:$true] %s17_s13  ;;  %s26_s16 = int_to_ptr.hbm [resolvable:$true] %s25_s16 }
   0x4   :  { %20 = dma.hbm_to_vmem [thread:$0]  %s16_s11, 128, %s18_s13, [#allocation3]  }
   0x5   :  { %s441_s17 = smov [#allocation5]   ;;  %s442_s19 = smov 128  }
   0x6   :  { %s27_s18 = sshll.u32 %s441_s17, 4  ;;  %s443_s20 = smov 8   ;;  %s28_s18 = int_to_ptr.vmem [resolvable:$true] %s27_s18 }
   0x7   :  { %33 = dma.hbm_to_vmem [thread:$0]  %s26_s16, 256, %s28_s18, [#allocation6], %s442_s19, %s442_s19, %s443_s20  }
   0x8   :  { %434 = dma.done.wait [#allocation3], 128  }
   0x9   :  { %435 = vsyncadd [#allocation3], 4294967168 }
   0xa   :  { %436 = dma.done.wait [#allocation6], 256  }
   0xb   :  { %437 = vsyncadd [#allocation6], 4294967040  ;;  %v444_v0 = vmov 0   ;;  %v445_v1 = vmov 2   ;;  %v478_v2 = vld [vmem:[#allocation2] sm:$0xff]  ;;  %v446_v3 = vmov 1  }
   0xc   :  { %317 = vset.pattern.permute.xlu0 %v444_v0  ;;  %319 = vset.pattern.permute.xlu1 %v445_v1  ;;  %v447_v4 = vmov 3   ;;  %v43_v5 = vld [vmem:[#allocation5] sm:$0xff]  ;;  %v448_v22 = vmov 4   ;;  %v449_v23 = vmov 5   ;;  %v509_v30 = vld [vmem:[#allocation5 + $0x8] sm:$0xff]  ;;  %v450_v52 = vmov 6  }
   0xd   :  { %321 = vset.pattern.permute.xlu2 %v444_v0  ;;  %47 = vperm.xlu0 %317, %v478_v2   ;;  %v486_v7 = vperm.slane %v43_v5, 0  ;;  %v488_v8 = vperm.slane %v43_v5, 4  ;;  %v491_v10 = vperm.slane %v43_v5, 1  ;;  %v493_v11 = vperm.slane %v43_v5, 2  ;;  %s454_s0 = smov [#allocation7]   ;;  %s291_s23 = sshll.u32 %s587_s2, 4  ;;  %s292_s23 = int_to_ptr.hbm [resolvable:$true] %s291_s23 }
   0xe   :  { %92 = vperm.xlu1 %319, %v478_v2   ;;  %v495_v12 = vperm.slane %v43_v5, 3  ;;  %v511_v31 = vperm.slane %v43_v5, 5  ;;  %v514_v32 = vperm.slane %v509_v30, 1  ;;  %v516_v33 = vperm.slane %v43_v5, 7  ;;  %s289_s1 = sshll.u32 %s454_s0, 4  ;;  %s290_s1 = int_to_ptr.vmem [resolvable:$true] %s289_s1 }
   0xf   :  { %v62_v15 = vmul.f32 0.0, %v493_v11  ;;  %v520_v37 = vperm.slane %v43_v5, 6  ;;  %v523_v38 = vperm.slane %v509_v30, 0  ;;  %v451_v53 = vmov 7  }
  0x10   :  { %v65_v17 = vmul.f32 0.0, %v495_v12  ;;  %v85_v39 = vmul.f32 0.0, %v516_v33 }
  0x11   :  { %v88_v45 = vmul.f32 0.0, %v523_v38 }
  0x15   :  { %318 = vset.pattern.permute.xlu0 %v446_v3 }
  0x16   :  { %320 = vset.pattern.permute.xlu1 %v447_v4  ;;  %55 = vperm.xlu0 %318, %v478_v2  }
  0x17   :  { %98 = vperm.xlu1 %320, %v478_v2  }
  0x1e   :  { %325 = vset.pattern.permute.xlu0 %v444_v0 }
  0x1f   :  { %323 = vset.pattern.permute.xlu1 %v448_v22  ;;  %v452_v22 = vmov 8  }
  0x20   :  { %136 = vperm.xlu1 %323, %v478_v2  }
  0x28   :  { %326 = vset.pattern.permute.xlu1 %v446_v3 }
  0x7f   :  { %v48_v6 = vpop.permute.xlu0 %47 }
  0x80   :  { %v51_v9 = vmul.f32 %v486_v7, %v48_v6  ;;  %v93_v24 = vpop.permute.xlu1 %92 }
  0x81   :  { %v95_v25 = vmul.f32 %v93_v24, %v486_v7 }
  0x82   :  { %v53_v14 = vadd.f32 %v488_v8, %v51_v9 }
  0x83   :  { %v96_v28 = vadd.f32 %v95_v25, %v488_v8 }
  0x88   :  { %v56_v13 = vpop.permute.xlu0 %55 }
  0x89   :  { %v59_v16 = vmul.f32 %v491_v10, %v56_v13  ;;  %v99_v26 = vpop.permute.xlu1 %98 }
  0x8a   :  { %v101_v29 = vmul.f32 %v99_v26, %v491_v10 }
  0x8b   :  { %v60_v18 = vadd.f32 %v59_v16, %v53_v14 }
  0x8c   :  { %v102_v34 = vadd.f32 %v101_v29, %v96_v28 }
  0x8d   :  { %v63_v19 = vadd.f32 %v62_v15, %v60_v18 }
  0x8f   :  { %v66_v20 = vadd.f32 %v65_v17, %v63_v19 }
  0x91   :  { %342 = vtanh.f32 %v66_v20 }
  0x92   :  { %v137_v54 = vpop.permute.xlu1 %136 }
  0x93   :  { %v139_v55 = vmul.f32 %v137_v54, %v486_v7 }
  0x95   :  { %v140_v58 = vadd.f32 %v139_v55, %v488_v8 }
  0x97   :  { %v343_v21 = vpop.eup %342 }
  0x98   :  { %70 = vperm.xlu2 %321, %v343_v21  }
  0xa0   :  { %322 = vset.pattern.permute.xlu2 %v446_v3 }
  0xa1   :  { %78 = vperm.xlu2 %322, %v343_v21  }
  0xa9   :  { %324 = vset.pattern.permute.xlu2 %v449_v23  ;;  %v453_v23 = vmov 9  }
  0xaa   :  { %142 = vperm.xlu2 %324, %v478_v2  }
  0xb2   :  { %327 = vset.pattern.permute.xlu2 %v444_v0 }
  0xf2   :  { %v71_v27 = vpop.permute.xlu2 %70 }
  0xf3   :  { %v74_v35 = vmul.f32 %v511_v31, %v71_v27  ;;  %v103_v36 = vmul.f32 %v71_v27, %v493_v11 }
  0xf5   :  { %v76_v41 = vadd.f32 %v514_v32, %v74_v35  ;;  %v104_v42 = vadd.f32 %v103_v36, %v102_v34 }
  0xfb   :  { %v79_v40 = vpop.permute.xlu2 %78 }
  0xfc   :  { %v82_v43 = vmul.f32 %v520_v37, %v79_v40  ;;  %v105_v44 = vmul.f32 %v79_v40, %v495_v12 }
  0xfe   :  { %v83_v46 = vadd.f32 %v82_v43, %v76_v41  ;;  %v106_v47 = vadd.f32 %v105_v44, %v104_v42 }
 0x100   :  { %v86_v48 = vadd.f32 %v85_v39, %v83_v46  ;;  %344 = vtanh.f32 %v106_v47 }
 0x102   :  { %v89_v49 = vadd.f32 %v88_v45, %v86_v48 }
 0x104   :  { %346 = vtanh.f32 %v89_v49  ;;  %v143_v56 = vpop.permute.xlu2 %142 }
 0x105   :  { %v145_v57 = vmul.f32 %v143_v56, %v491_v10 }
 0x106   :  { %v345_v50 = vpop.eup %344 }
 0x107   :  { %116 = vperm.xlu1 %326, %v345_v50   ;;  %110 = vperm.xlu0 %325, %v345_v50   ;;  %v146_v61 = vadd.f32 %v145_v57, %v140_v58 }
 0x10a   :  { %v347_v51 = vpop.eup %346 }
 0x10b   :  { %123 = vperm.xlu2 %327, %v347_v51  }
 0x10f   :  { %129 = vperm.xlu1 %326, %v347_v51   ;;  %329 = vset.pattern.permute.xlu0 %v451_v53 }
 0x110   :  { %186 = vperm.xlu0 %329, %v478_v2  }
 0x113   :  { %328 = vset.pattern.permute.xlu2 %v450_v52 }
 0x114   :  { %180 = vperm.xlu2 %328, %v478_v2  }
 0x117   :  { %330 = vset.pattern.permute.xlu1 %v444_v0 }
 0x118   :  { %332 = vset.pattern.permute.xlu0 %v452_v22 }
 0x119   :  { %224 = vperm.xlu0 %332, %v478_v2  }
 0x11c   :  { %331 = vset.pattern.permute.xlu2 %v446_v3 }
 0x121   :  { %336 = vset.pattern.permute.xlu0 %v446_v3 }
 0x165   :  { %v124_v9 = vpop.permute.xlu2 %123 }
 0x166   :  { %v126_v15 = vmul.f32 %v124_v9, %v516_v33 }
 0x16e   :  { %v181_v24 = vpop.permute.xlu2 %180 }
 0x16f   :  { %v183_v25 = vmul.f32 %v181_v24, %v486_v7 }
 0x171   :  { %v184_v27 = vadd.f32 %v183_v25, %v488_v8 }
 0x179   :  { %v117_v59 = vpop.permute.xlu1 %116  ;;  %v111_v60 = vpop.permute.xlu0 %110 }
 0x17a   :  { %v113_v62 = vmul.f32 %v111_v60, %v511_v31  ;;  %v147_v63 = vmul.f32 %v111_v60, %v493_v11  ;;  %v119_v1 = vmul.f32 %v117_v59, %v520_v37  ;;  %v149_v4 = vmul.f32 %v117_v59, %v495_v12 }
 0x17c   :  { %v114_v5 = vadd.f32 %v113_v62, %v514_v32  ;;  %v148_v6 = vadd.f32 %v147_v63, %v146_v61 }
 0x17e   :  { %v120_v13 = vadd.f32 %v119_v1, %v114_v5  ;;  %v150_v14 = vadd.f32 %v149_v4, %v148_v6 }
 0x180   :  { %348 = vtanh.f32 %v150_v14  ;;  %v127_v17 = vadd.f32 %v126_v15, %v120_v13 }
 0x181   :  { %v130_v16 = vpop.permute.xlu1 %129 }
 0x182   :  { %v132_v18 = vmul.f32 %v130_v16, %v523_v38  ;;  %v187_v26 = vpop.permute.xlu0 %186 }
 0x183   :  { %v189_v28 = vmul.f32 %v187_v26, %v491_v10 }
 0x184   :  { %v133_v19 = vadd.f32 %v132_v18, %v127_v17 }
 0x185   :  { %v190_v35 = vadd.f32 %v189_v28, %v184_v27 }
 0x186   :  { %v349_v20 = vpop.eup %348  ;;  %350 = vtanh.f32 %v133_v19 }
 0x187   :  { %160 = vperm.xlu2 %331, %v349_v20   ;;  %154 = vperm.xlu1 %330, %v349_v20  }
 0x18b   :  { %v225_v53 = vpop.permute.xlu0 %224 }
 0x18c   :  { %v351_v21 = vpop.eup %350  ;;  %v227_v54 = vmul.f32 %v225_v53, %v486_v7 }
 0x18e   :  { %v228_v56 = vadd.f32 %v227_v54, %v488_v8 }
 0x18f   :  { %173 = vperm.xlu2 %331, %v351_v21   ;;  %167 = vperm.xlu1 %330, %v351_v21  }
 0x197   :  { %334 = vset.pattern.permute.xlu2 %v444_v0  ;;  %333 = vset.pattern.permute.xlu1 %v453_v23 }
 0x198   :  { %230 = vperm.xlu1 %333, %v478_v2  }
 0x1a0   :  { %335 = vset.pattern.permute.xlu1 %v446_v3 }
 0x1e1   :  { %v161_v29 = vpop.permute.xlu2 %160 }
 0x1e2   :  { %v193_v2 = vmul.f32 %v161_v29, %v495_v12  ;;  %v163_v43 = vmul.f32 %v161_v29, %v520_v37 }
 0x1e9   :  { %v174_v44 = vpop.permute.xlu2 %173 }
 0x1ea   :  { %v176_v48 = vmul.f32 %v174_v44, %v523_v38 }
 0x1f9   :  { %v155_v34 = vpop.permute.xlu1 %154 }
 0x1fa   :  { %v157_v36 = vmul.f32 %v155_v34, %v511_v31  ;;  %v191_v39 = vmul.f32 %v155_v34, %v493_v11 }
 0x1fc   :  { %v192_v40 = vadd.f32 %v191_v39, %v190_v35  ;;  %v158_v41 = vadd.f32 %v157_v36, %v514_v32 }
 0x1fe   :  { %v194_v42 = vadd.f32 %v193_v2, %v192_v40  ;;  %v164_v46 = vadd.f32 %v163_v43, %v158_v41 }
 0x200   :  { %352 = vtanh.f32 %v194_v42 }
 0x201   :  { %v168_v45 = vpop.permute.xlu1 %167 }
 0x202   :  { %v170_v47 = vmul.f32 %v168_v45, %v516_v33 }
 0x204   :  { %v171_v49 = vadd.f32 %v170_v47, %v164_v46 }
 0x206   :  { %v353_v50 = vpop.eup %352  ;;  %v177_v51 = vadd.f32 %v176_v48, %v171_v49 }
 0x207   :  { %204 = vperm.xlu1 %335, %v353_v50   ;;  %198 = vperm.xlu2 %334, %v353_v50  }
 0x208   :  { %354 = vtanh.f32 %v177_v51 }
 0x20a   :  { %v231_v55 = vpop.permute.xlu1 %230 }
 0x20b   :  { %v233_v57 = vmul.f32 %v231_v55, %v491_v10 }
 0x20d   :  { %v234_v59 = vadd.f32 %v233_v57, %v228_v56 }
 0x20e   :  { %v355_v52 = vpop.eup %354 }
 0x20f   :  { %217 = vperm.xlu0 %336, %v355_v52   ;;  %211 = vperm.xlu2 %334, %v355_v52  }
 0x210   :  { %337 = vset.pattern.permute.xlu1 %v444_v0 }
 0x217   :  { %338 = vset.pattern.permute.xlu2 %v446_v3  ;;  %339 = vset.pattern.permute.xlu0 %v444_v0 }
 0x261   :  { %v199_v58 = vpop.permute.xlu2 %198 }
 0x262   :  { %v235_v60 = vmul.f32 %v199_v58, %v493_v11  ;;  %v201_v61 = vmul.f32 %v199_v58, %v511_v31 }
 0x264   :  { %v236_v63 = vadd.f32 %v235_v60, %v234_v59  ;;  %v202_v4 = vadd.f32 %v201_v61, %v514_v32 }
 0x269   :  { %v212_v5 = vpop.permute.xlu2 %211 }
 0x26a   :  { %v214_v8 = vmul.f32 %v212_v5, %v516_v33 }
 0x279   :  { %v205_v62 = vpop.permute.xlu1 %204 }
 0x27a   :  { %v207_v1 = vmul.f32 %v205_v62, %v520_v37  ;;  %v237_v0 = vmul.f32 %v205_v62, %v495_v12 }
 0x27c   :  { %v238_v7 = vadd.f32 %v237_v0, %v236_v63  ;;  %v208_v6 = vadd.f32 %v207_v1, %v202_v4 }
 0x27e   :  { %356 = vtanh.f32 %v238_v7  ;;  %v215_v9 = vadd.f32 %v214_v8, %v208_v6 }
 0x281   :  { %v218_v10 = vpop.permute.xlu0 %217 }
 0x282   :  { %v220_v11 = vmul.f32 %v218_v10, %v523_v38 }
 0x284   :  { %v357_v13 = vpop.eup %356  ;;  %v221_v14 = vadd.f32 %v220_v11, %v215_v9 }
 0x285   :  { %248 = vperm.xlu2 %338, %v357_v13   ;;  %242 = vperm.xlu1 %337, %v357_v13  }
 0x286   :  { %358 = vtanh.f32 %v221_v14 }
 0x28c   :  { %v359_v15 = vpop.eup %358 }
 0x28d   :  { %261 = vperm.xlu2 %338, %v359_v15   ;;  %255 = vperm.xlu1 %337, %v359_v15  }
 0x295   :  { %340 = vset.pattern.permute.xlu1 %v446_v3 }
 0x2df   :  { %v249_v12 = vpop.permute.xlu2 %248 }
 0x2e0   :  { %v251_v19 = vmul.f32 %v249_v12, %v520_v37  ;;  %v274_v37 = vperm.slane %v509_v30, 4 }
 0x2e7   :  { %v262_v20 = vpop.permute.xlu2 %261 }
 0x2e8   :  { %v264_v24 = vmul.f32 %v262_v20, %v523_v38 }
 0x2f7   :  { %v243_v16 = vpop.permute.xlu1 %242 }
 0x2f8   :  { %v245_v17 = vmul.f32 %v243_v16, %v511_v31  ;;  %v272_v31 = vperm.slane %v509_v30, 2 }
 0x2fa   :  { %v246_v18 = vadd.f32 %v245_v17, %v514_v32  ;;  %v280_v32 = vperm.slane %v509_v30, 3 }
 0x2fc   :  { %v252_v22 = vadd.f32 %v251_v19, %v246_v18 }
 0x2ff   :  { %v256_v21 = vpop.permute.xlu1 %255 }
 0x300   :  { %v258_v23 = vmul.f32 %v256_v21, %v516_v33 }
 0x302   :  { %v259_v25 = vadd.f32 %v258_v23, %v252_v22 }
 0x304   :  { %v265_v26 = vadd.f32 %v264_v24, %v259_v25 }
 0x306   :  { %360 = vtanh.f32 %v265_v26 }
 0x30c   :  { %v361_v27 = vpop.eup %360 }
 0x30d   :  { %277 = vperm.xlu1 %340, %v361_v27   ;;  %269 = vperm.xlu0 %339, %v361_v27  }
 0x315   :  { %341 = vset.pattern.permute.xlu0 %v446_v3 }
 0x37f   :  { %v278_v28 = vpop.permute.xlu1 %277  ;;  %v270_v29 = vpop.permute.xlu0 %269 }
 0x380   :  { %v273_v34 = vmul.f32 %v272_v31, %v270_v29  ;;  %v281_v33 = vmul.f32 %v280_v32, %v278_v28 }
 0x382   :  { %v275_v38 = vadd.f32 %v274_v37, %v273_v34 }
 0x384   :  { %v282_v35 = vadd.f32 %v281_v33, %v275_v38 }
 0x386   :  { %283 = vst [vmem:[#allocation7] sm:$0xff] %v282_v35 }
 0x387   :  { %294 = dma.vmem_to_hbm [thread:$0]  %s290_s1, 128, %s292_s23, [#allocation4]  }
 0x388   :  { %438 = dma.done.wait [#allocation4], 128  }
 0x389   :  { %439 = vsyncadd [#allocation4], 4294967168 }
 0x38a   :  { %299 = vsyncpa [#allocation3], 1 }
 0x38b   :  { %300 = vsyncpa [#allocation6], 1 }
 0x38c   :  { %301 = vsyncpa [#allocation4], 1 }

</bundles_post_ra>
